<compile_context>
chip_gen: v7x
topology: tpu7x:2x2x1
jax: 0.10.0
libtpu: 0.0.40
codegen_flags: <defaults>
</compile_context>

<pallas_src>
import functools

import jax
import jax.numpy as jnp
from jax import lax
from jax.experimental import pallas as pl
from jax.experimental.pallas import tpu as pltpu


def _round_up(x, m):
    return (x + m - 1) // m * m


_EPS2 = 1e-24  # eps^2; x * rsqrt(max(sumsq, eps^2)) == x / max(||x||, 1e-12)


# ----------------------------- kernel helpers --------------------------------
def _l2_normalize(x):
    # EUP rsqrt instead of sqrt + divide on the VALU.
    return x * lax.rsqrt(jnp.maximum(jnp.sum(x * x, axis=-1, keepdims=True), _EPS2))


def _weighted_text_mean(txt_ref, mask_ref, n_texts, h_txt):
    """Masked mean over texts on the flattened (TB, N*H_txt) bf16 block.

    mask_ref is (TB, N) f32 with 1/clamp(count,1) pre-folded, so this is a single
    weighted sum; accumulation stays in f32 (precision), multiply per lane slice.
    """
    sm = mask_ref[...]                                              # (TB, N) f32
    agg = txt_ref[:, 0:h_txt].astype(jnp.float32) * sm[:, 0:1]
    for n in range(1, n_texts):                                     # short static unroll
        agg = agg + (txt_ref[:, n * h_txt:(n + 1) * h_txt].astype(jnp.float32)
                     * sm[:, n:n + 1])
    return agg


# ----------------------------- Pallas kernels --------------------------------
def _packed_kernel(ts_ref, txt_ref, mask_ref, w_ref, b_ref, o_ref, *, n_texts, h_txt):
    """P < 128 path: both heads packed into one lane-dense (TB, P_pad) slab,
    single fused MXU call over the stacked (H_ts+H_txt, P_pad) weight."""
    agg = _weighted_text_mean(txt_ref, mask_ref, n_texts, h_txt)    # (TB, H_txt) f32
    ts_n = _l2_normalize(ts_ref[...].astype(jnp.float32))           # (TB, H_ts)
    tx_n = _l2_normalize(agg)                                       # (TB, H_txt)
    x = jnp.concatenate([ts_n, tx_n], axis=-1).astype(jnp.bfloat16)  # (TB, H_ts+H_txt)
    o_ref[...] = jnp.dot(x, w_ref[...],
                         preferred_element_type=jnp.float32) + b_ref[...]


def _split_kernel(ts_ref, txt_ref, mask_ref, wts_ref, wtx_ref, bts_ref, btx_ref,
                  ots_ref, otx_ref, *, n_texts, h_txt):
    """P >= 128 path: each head gets its own lane-dense output (no packed-column
    zero padding -> no wasted MXU FLOPs or store bytes)."""
    agg = _weighted_text_mean(txt_ref, mask_ref, n_texts, h_txt)
    ts_n = _l2_normalize(ts_ref[...].astype(jnp.float32))
    tx_n = _l2_normalize(agg)
    ots_ref[...] = jnp.dot(ts_n.astype(jnp.bfloat16), wts_ref[...],
                           preferred_element_type=jnp.float32) + bts_ref[...]
    otx_ref[...] = jnp.dot(tx_n.astype(jnp.bfloat16), wtx_ref[...],
                           preferred_element_type=jnp.float32) + btx_ref[...]


# ------------------------------ kernel wrapper --------------------------------
def contrastive_projection(ts_emb, txt_emb, non_empty_mask,
                           w_ts, b_ts, w_txt, b_txt, *, tb=None):
    """Masked-mean text aggregation + L2 normalize + both projection heads."""
    B, H_ts = ts_emb.shape
    _, N, H_txt = txt_emb.shape
    P = w_ts.shape[1]

    packed = P < 128                       # packed-column slab only pays when P is lane-sparse
    P1 = _round_up(P, 128)                 # per-head lane-dense width (split path)
    P_pad = _round_up(2 * P, 128)          # packed slab width

    # --- VMEM budget per generation (v7x: 64 MiB/TC; v5e/v6e: 128 MiB) ---
    try:
        vmem_cap = int(pltpu.get_tpu_info().vmem_capacity_bytes)
    except Exception:
        vmem_cap = 64 << 20
    vmem_budget = max(min(vmem_cap - (16 << 20), 48 << 20), 16 << 20)

    if packed:
        const_bytes = 2 * ((H_ts + H_txt) * P_pad * 2 + P_pad * 4)
        out_row_bytes = P_pad * 4
    else:
        const_bytes = 2 * ((H_ts + H_txt) * P1 * 2 + 2 * P1 * 4)
        out_row_bytes = 2 * P1 * 4
    per_row_bytes = H_ts * 2 + N * H_txt * 2 + N * 4 + out_row_bytes

    # --- batch tile: big blocks on 128 MiB parts, halve until double-buffered fit ---
    if tb is None:
        tb = 512 if vmem_cap >= (100 << 20) else 256
    while tb > 8 and 2 * tb * per_row_bytes + const_bytes > vmem_budget:
        tb //= 2
    if B <= tb:
        TB, B_pad = B, B                   # block == full array dims -> no (8,128) issue, no pad
    else:
        TB = tb
        B_pad = _round_up(B, TB)
    pad_b = B_pad - B

    # --- fold 1/clamp(count,1) into the mask: kernel does a single weighted sum ---
    counts = jnp.sum(non_empty_mask, axis=1, keepdims=True)
    scaled_mask = (non_empty_mask / jnp.maximum(counts, 1.0)).astype(jnp.float32)

    # --- flatten text stream to 2-D (lane/sublane-dense dominant block); encoders
    #     already emit bf16, so no extra wrapper-side cast/pad round trip unless the
    #     batch actually needs padding. ---
    ts_in = ts_emb if ts_emb.dtype == jnp.bfloat16 else ts_emb.astype(jnp.bfloat16)
    txt_in = txt_emb.reshape(B, N * H_txt)
    txt_in = txt_in if txt_in.dtype == jnp.bfloat16 else txt_in.astype(jnp.bfloat16)
    if pad_b:
        ts_in = jnp.pad(ts_in, ((0, pad_b), (0, 0)))
        txt_in = jnp.pad(txt_in, ((0, pad_b), (0, 0)))
        scaled_mask = jnp.pad(scaled_mask, ((0, pad_b), (0, 0)))

    grid = (B_pad // TB,)
    vmem_limit = int(max(min(2 * (2 * TB * per_row_bytes + const_bytes), vmem_budget),
                         16 << 20))
    compiler_params = pltpu.CompilerParams(
        dimension_semantics=("parallel",),           # pipelined + megacore-shardable
        vmem_limit_bytes=vmem_limit)
    # NOTE: weight/bias blocks use a constant index_map so they stay VMEM-resident
    # across B-tiles (default buffering kept for maximum compatibility).

    agg_flops = 2 * B_pad * N * H_txt + 4 * B_pad * (H_ts + H_txt)

    if packed:
        # Stack both heads into one (H_ts+H_txt, P_pad) weight: ts head -> cols [0:P],
        # text head -> cols [P:2P]  => one fused MXU call + one lane-dense store.
        w_cat = jnp.zeros((H_ts + H_txt, P_pad), jnp.bfloat16)
        w_cat = w_cat.at[:H_ts, :P].set(w_ts.astype(jnp.bfloat16))
        w_cat = w_cat.at[H_ts:, P:2 * P].set(w_txt.astype(jnp.bfloat16))
        b_cat = jnp.zeros((1, P_pad), jnp.float32)
        b_cat = b_cat.at[:, :P].set(b_ts.reshape(1, P).astype(jnp.float32))
        b_cat = b_cat.at[:, P:2 * P].set(b_txt.reshape(1, P).astype(jnp.float32))

        cost = pl.CostEstimate(
            flops=agg_flops + 2 * B_pad * (H_ts + H_txt) * P_pad,
            transcendentals=2 * B_pad,
            bytes_accessed=(ts_in.size * 2 + txt_in.size * 2 + scaled_mask.size * 4
                            + w_cat.size * 2 + b_cat.size * 4 + B_pad * P_pad * 4))

        out = pl.pallas_call(
            functools.partial(_packed_kernel, n_texts=N, h_txt=H_txt),
            out_shape=jax.ShapeDtypeStruct((B_pad, P_pad), jnp.float32),
            grid=grid,
            in_specs=[
                pl.BlockSpec((TB, H_ts), lambda i: (i, 0)),
                pl.BlockSpec((TB, N * H_txt), lambda i: (i, 0)),
                pl.BlockSpec((TB, N), lambda i: (i, 0)),
                pl.BlockSpec((H_ts + H_txt, P_pad), lambda i: (0, 0)),  # VMEM-resident
                pl.BlockSpec((1, P_pad), lambda i: (0, 0)),
            ],
            out_specs=pl.BlockSpec((TB, P_pad), lambda i: (i, 0)),
            compiler_params=compiler_params,
            cost_estimate=cost,
        )(ts_in, txt_in, scaled_mask, w_cat, b_cat)
        return out[:B, :P], out[:B, P:2 * P]

    # P already lane-dense: two separate matmuls, two lane-dense outputs.
    wts_p = jnp.zeros((H_ts, P1), jnp.bfloat16).at[:, :P].set(w_ts.astype(jnp.bfloat16))
    wtx_p = jnp.zeros((H_txt, P1), jnp.bfloat16).at[:, :P].set(w_txt.astype(jnp.bfloat16))
    bts_p = jnp.zeros((1, P1), jnp.float32).at[:, :P].set(
        b_ts.reshape(1, P).astype(jnp.float32))
    btx_p = jnp.zeros((1, P1), jnp.float32).at[:, :P].set(
        b_txt.reshape(1, P).astype(jnp.float32))

    cost = pl.CostEstimate(
        flops=agg_flops + 2 * B_pad * (H_ts + H_txt) * P1,
        transcendentals=2 * B_pad,
        bytes_accessed=(ts_in.size * 2 + txt_in.size * 2 + scaled_mask.size * 4
                        + (wts_p.size + wtx_p.size) * 2
                        + (bts_p.size + btx_p.size) * 4 + 2 * B_pad * P1 * 4))

    out_ts, out_tx = pl.pallas_call(
        functools.partial(_split_kernel, n_texts=N, h_txt=H_txt),
        out_shape=(jax.ShapeDtypeStruct((B_pad, P1), jnp.float32),
                   jax.ShapeDtypeStruct((B_pad, P1), jnp.float32)),
        grid=grid,
        in_specs=[
            pl.BlockSpec((TB, H_ts), lambda i: (i, 0)),
            pl.BlockSpec((TB, N * H_txt), lambda i: (i, 0)),
            pl.BlockSpec((TB, N), lambda i: (i, 0)),
            pl.BlockSpec((H_ts, P1), lambda i: (0, 0)),
            pl.BlockSpec((H_txt, P1), lambda i: (0, 0)),
            pl.BlockSpec((1, P1), lambda i: (0, 0)),
            pl.BlockSpec((1, P1), lambda i: (0, 0)),
        ],
        out_specs=(pl.BlockSpec((TB, P1), lambda i: (i, 0)),
                   pl.BlockSpec((TB, P1), lambda i: (i, 0))),
        compiler_params=compiler_params,
        cost_estimate=cost,
    )(ts_in, txt_in, scaled_mask, wts_p, wtx_p, bts_p, btx_p)
    return out_ts[:B, :P], out_tx[:B, :P]


# ------------------------- synthetic encoders (glue) ------------------------
def ts_encoder(ts_data, w_enc, b_enc, out_dtype=jnp.bfloat16):
    # mean-pool over time, then linear -> (B, H_ts); cast fused into the last op
    pooled = jnp.mean(ts_data, axis=1)
    return (pooled @ w_enc + b_enc).astype(out_dtype)


def text_encoder(input_ids, attention_mask, embed_table, out_dtype=jnp.bfloat16):
    # bag-of-embeddings with attention-mask-weighted mean -> (B*N, H_txt)
    emb = embed_table[input_ids]                          # (BN, L, H_txt)
    m = attention_mask[..., None].astype(jnp.float32)
    s = jnp.sum(emb * m, axis=1)
    c = jnp.maximum(jnp.sum(m, axis=1), 1.0)
    return (s / c).astype(out_dtype)


# ------------------------------ full forward --------------------------------
def forward(ts_data, input_ids, attention_mask, params):
    B, N, L = input_ids.shape

    ts_embeddings = ts_encoder(ts_data, params["w_ts_enc"], params["b_ts_enc"])

    empty_texts = jnp.all(input_ids == 0, axis=-1)        # (B, N)
    non_empty_mask = (~empty_texts).astype(jnp.float32)   # (B, N)

    flat_ids = input_ids.reshape(B * N, L)
    flat_mask = attention_mask.reshape(B * N, L)
    text_embeddings = text_encoder(flat_ids, flat_mask, params["embed_table"])
    text_embeddings = text_embeddings.reshape(B, N, -1)

    # TODO(synk): fuse the embedding gather + attention-weighted mean into the Pallas
    # kernel (PrefetchScalarGridSpec / manual gather DMA) so the (B,N,H_txt)
    # intermediate never round-trips HBM; text_encoder is an external nn.Module in
    # the original code, so it remains plain-JAX glue here.
    return contrastive_projection(
        ts_embeddings,
        text_embeddings,
        non_empty_mask,
        params["w_ts_proj"], params["b_ts_proj"],
        params["w_txt_proj"], params["b_txt_proj"])


def forward_reference(ts_data, input_ids, attention_mask, params):
    """Pure-JAX f32 reference of the same forward pass (mean aggregation)."""
    B, N, L = input_ids.shape
    ts_embeddings = ts_encoder(ts_data, params["w_ts_enc"], params["b_ts_enc"],
                               out_dtype=jnp.float32)
    empty_texts = jnp.all(input_ids == 0, axis=-1)
    non_empty_mask = (~empty_texts).astype(jnp.float32)[:, :, None]
    flat_ids = input_ids.reshape(B * N, L)
    flat_mask = attention_mask.reshape(B * N, L)
    txt = text_encoder(flat_ids, flat_mask, params["embed_table"],
                       out_dtype=jnp.float32).reshape(B, N, -1)
    summed = jnp.sum(txt * non_empty_mask, axis=1)
    counts = jnp.maximum(jnp.sum(non_empty_mask, axis=1), 1.0)
    agg = summed / counts

    def l2n(x):
        return x / jnp.maximum(jnp.linalg.norm(x, axis=-1, keepdims=True), 1e-12)

    p_ts = l2n(ts_embeddings) @ params["w_ts_proj"] + params["b_ts_proj"]
    p_txt = l2n(agg) @ params["w_txt_proj"] + params["b_txt_proj"]
    return p_ts, p_txt


# ---------------------------------- main -------------------------------------
if __name__ == "__main__":
    # small shapes
    B, T, F = 4, 16, 4           # time series: (B, T, F)
    N, L = 3, 8                  # texts per sample, tokens per text
    H_ts, H_txt, P = 32, 32, 16  # encoder hidden dims, projection dim
    VOCAB = 64

    key = jax.random.PRNGKey(0)
    keys = jax.random.split(key, 8)

    params = {
        "w_ts_enc":  jax.random.normal(keys[0], (F, H_ts), jnp.float32) * 0.1,
        "b_ts_enc":  jax.random.normal(keys[1], (H_ts,), jnp.float32) * 0.01,
        "embed_table": jax.random.normal(keys[2], (VOCAB, H_txt), jnp.float32) * 0.1,
        "w_ts_proj": jax.random.normal(keys[3], (H_ts, P), jnp.float32) * 0.1,
        "b_ts_proj": jax.random.normal(keys[4], (P,), jnp.float32) * 0.01,
        "w_txt_proj": jax.random.normal(keys[5], (H_txt, P), jnp.float32) * 0.1,
        "b_txt_proj": jax.random.normal(keys[6], (P,), jnp.float32) * 0.01,
    }

    ts_data = jax.random.normal(keys[7], (B, T, F), jnp.float32)

    # token ids in [1, VOCAB); deliberately zero out some texts to exercise the mask
    input_ids = jax.random.randint(jax.random.PRNGKey(1), (B, N, L), 1, VOCAB)
    input_ids = input_ids.at[0, 2].set(0)       # sample 0, text 2 is empty
    input_ids = input_ids.at[1, 1:].set(0)      # sample 1, texts 1..2 are empty
    attention_mask = (input_ids != 0).astype(jnp.int32)

    proj_ts, proj_txt = forward(ts_data, input_ids, attention_mask, params)
    jax.block_until_ready((proj_ts, proj_txt))

    ref_ts, ref_txt = forward_reference(ts_data, input_ids, attention_mask, params)
    assert proj_ts.shape == (B, P) and proj_txt.shape == (B, P)
    # bf16 activations / weights vs f32 reference -> loosened tolerance
    assert jnp.allclose(proj_ts, ref_ts, atol=2e-2, rtol=2e-2)
    assert jnp.allclose(proj_txt, ref_txt, atol=2e-2, rtol=2e-2)

    # TODO(synk): ts_encoder / text_encoder are external nn.Modules in the original
    # code; deterministic synthetic encoders are used here (glue, plain JAX).
    print("KERNEL_OK")
</pallas_src>

<mosaic_0001>
module attributes {stable_mosaic.version = 11 : i64} {
  func.func @_packed_kernel(%arg0: i32, %arg1: memref<4x32xbf16, #tpu.memory_space<vmem>>, %arg2: memref<4x96xbf16, #tpu.memory_space<vmem>>, %arg3: memref<4x3xf32, #tpu.memory_space<vmem>>, %arg4: memref<64x128xbf16, #tpu.memory_space<vmem>>, %arg5: memref<1x128xf32, #tpu.memory_space<vmem>>, %arg6: memref<4x128xf32, #tpu.memory_space<vmem>>) attributes {dimension_semantics = [#tpu.dimension_semantics<parallel>], iteration_bounds = array<i64: 1>, scalar_prefetch = 0 : i64, scratch_operands = 0 : i64, tpu.core_type = #tpu.core_type<tc>, window_params = [{transform_indices = @transform_0, window_bounds = array<i64: 4, 32>}, {transform_indices = @transform_1, window_bounds = array<i64: 4, 96>}, {transform_indices = @transform_2, window_bounds = array<i64: 4, 3>}, {pipeline_mode = #tpu.pipeline_mode<synchronous>, transform_indices = @transform_3, window_bounds = array<i64: 64, 128>}, {pipeline_mode = #tpu.pipeline_mode<synchronous>, transform_indices = @transform_4, window_bounds = array<i64: 1, 128>}, {transform_indices = @transform_5, window_bounds = array<i64: 4, 128>}]} {
    %c0 = arith.constant 0 : index
    %c0_0 = arith.constant 0 : index
    %0 = vector.load %arg3[%c0, %c0_0] : memref<4x3xf32, #tpu.memory_space<vmem>>, vector<4x3xf32>
    %c0_1 = arith.constant 0 : index
    %c0_2 = arith.constant 0 : index
    %1 = vector.load %arg2[%c0_1, %c0_2] : memref<4x96xbf16, #tpu.memory_space<vmem>>, vector<4x32xbf16>
    %2 = arith.extf %1 : vector<4x32xbf16> to vector<4x32xf32>
    %3 = vector.extract_strided_slice %0 {offsets = [0, 0], sizes = [4, 1], strides = [1, 1]} : vector<4x3xf32> to vector<4x1xf32>
    %4 = vector.broadcast %3 : vector<4x1xf32> to vector<4x32xf32>
    %5 = arith.mulf %2, %4 : vector<4x32xf32>
    %c0_3 = arith.constant 0 : index
    %c32 = arith.constant 32 : index
    %6 = vector.load %arg2[%c0_3, %c32] : memref<4x96xbf16, #tpu.memory_space<vmem>>, vector<4x32xbf16>
    %7 = arith.extf %6 : vector<4x32xbf16> to vector<4x32xf32>
    %8 = vector.extract_strided_slice %0 {offsets = [0, 1], sizes = [4, 1], strides = [1, 1]} : vector<4x3xf32> to vector<4x1xf32>
    %9 = vector.broadcast %8 : vector<4x1xf32> to vector<4x32xf32>
    %10 = arith.mulf %7, %9 : vector<4x32xf32>
    %11 = arith.addf %5, %10 : vector<4x32xf32>
    %c0_4 = arith.constant 0 : index
    %c64 = arith.constant 64 : index
    %12 = vector.load %arg2[%c0_4, %c64] : memref<4x96xbf16, #tpu.memory_space<vmem>>, vector<4x32xbf16>
    %13 = arith.extf %12 : vector<4x32xbf16> to vector<4x32xf32>
    %14 = vector.extract_strided_slice %0 {offsets = [0, 2], sizes = [4, 1], strides = [1, 1]} : vector<4x3xf32> to vector<4x1xf32>
    %15 = vector.broadcast %14 : vector<4x1xf32> to vector<4x32xf32>
    %16 = arith.mulf %13, %15 : vector<4x32xf32>
    %17 = arith.addf %11, %16 : vector<4x32xf32>
    %c0_5 = arith.constant 0 : index
    %c0_6 = arith.constant 0 : index
    %18 = vector.load %arg1[%c0_5, %c0_6] : memref<4x32xbf16, #tpu.memory_space<vmem>>, vector<4x32xbf16>
    %19 = arith.extf %18 : vector<4x32xbf16> to vector<4x32xf32>
    %20 = arith.mulf %19, %19 : vector<4x32xf32>
    %cst = arith.constant dense<0.000000e+00> : vector<4xf32>
    %21 = vector.multi_reduction <add>, %20, %cst [1] : vector<4x32xf32> to vector<4xf32>
    %22 = vector.shape_cast %21 : vector<4xf32> to vector<4x1xf32>
    %cst_7 = arith.constant 1.000000e-24 : f32
    %23 = vector.broadcast %cst_7 : f32 to vector<4x1xf32>
    %24 = arith.maximumf %22, %23 : vector<4x1xf32>
    %25 = math.rsqrt %24 : vector<4x1xf32>
    %26 = vector.broadcast %25 : vector<4x1xf32> to vector<4x32xf32>
    %27 = arith.mulf %19, %26 : vector<4x32xf32>
    %28 = arith.mulf %17, %17 : vector<4x32xf32>
    %cst_8 = arith.constant dense<0.000000e+00> : vector<4xf32>
    %29 = vector.multi_reduction <add>, %28, %cst_8 [1] : vector<4x32xf32> to vector<4xf32>
    %30 = vector.shape_cast %29 : vector<4xf32> to vector<4x1xf32>
    %cst_9 = arith.constant 1.000000e-24 : f32
    %31 = vector.broadcast %cst_9 : f32 to vector<4x1xf32>
    %32 = arith.maximumf %30, %31 : vector<4x1xf32>
    %33 = math.rsqrt %32 : vector<4x1xf32>
    %34 = vector.broadcast %33 : vector<4x1xf32> to vector<4x32xf32>
    %35 = arith.mulf %17, %34 : vector<4x32xf32>
    %36 = tpu.concatenate %27, %35 in 1 : vector<4x32xf32>, vector<4x32xf32> -> vector<4x64xf32>
    %37 = arith.truncf %36 : vector<4x64xf32> to vector<4x64xbf16>
    %c0_10 = arith.constant 0 : index
    %c0_11 = arith.constant 0 : index
    %38 = vector.load %arg4[%c0_10, %c0_11] : memref<64x128xbf16, #tpu.memory_space<vmem>>, vector<64x128xbf16>
    %cst_12 = arith.constant dense<0.000000e+00> : vector<4x128xf32>
    %39 = tpu.matmul %37, %38, %cst_12 {dimension_numbers = #tpu.dot_dimension_numbers<[1], [0], [0], [1], [0, 0, 1, 1], [], []>} : vector<4x64xbf16>, vector<64x128xbf16>, vector<4x128xf32> -> vector<4x128xf32>
    %c0_13 = arith.constant 0 : index
    %c0_14 = arith.constant 0 : index
    %40 = vector.load %arg5[%c0_13, %c0_14] : memref<1x128xf32, #tpu.memory_space<vmem>>, vector<1x128xf32>
    %41 = vector.broadcast %40 : vector<1x128xf32> to vector<4x128xf32>
    %42 = arith.addf %39, %41 : vector<4x128xf32>
    %c0_15 = arith.constant 0 : index
    %c0_16 = arith.constant 0 : index
    %43 = vector.load %arg6[%c0_15, %c0_16] : memref<4x128xf32, #tpu.memory_space<vmem>>, vector<4x128xf32>
    tpu.vector_store %arg6[%c0_15, %c0_16], %42 {strides = array<i32>} : memref<4x128xf32, #tpu.memory_space<vmem>>, vector<4x128xf32>,
    return
  }
  func.func @transform_0(%arg0: i32) -> (i32, i32) {
    %c0_i32 = arith.constant 0 : i32
    %c0_i32_0 = arith.constant 0 : i32
    return %arg0, %c0_i32 : i32, i32
  }
  func.func @transform_1(%arg0: i32) -> (i32, i32) {
    %c0_i32 = arith.constant 0 : i32
    %c0_i32_0 = arith.constant 0 : i32
    return %arg0, %c0_i32 : i32, i32
  }
  func.func @transform_2(%arg0: i32) -> (i32, i32) {
    %c0_i32 = arith.constant 0 : i32
    %c0_i32_0 = arith.constant 0 : i32
    return %arg0, %c0_i32 : i32, i32
  }
  func.func @transform_3(%arg0: i32) -> (i32, i32) {
    %c0_i32 = arith.constant 0 : i32
    %c0_i32_0 = arith.constant 0 : i32
    %c0_i32_1 = arith.constant 0 : i32
    return %c0_i32, %c0_i32_0 : i32, i32
  }
  func.func @transform_4(%arg0: i32) -> (i32, i32) {
    %c0_i32 = arith.constant 0 : i32
    %c0_i32_0 = arith.constant 0 : i32
    %c0_i32_1 = arith.constant 0 : i32
    return %c0_i32, %c0_i32_0 : i32, i32
  }
  func.func @transform_5(%arg0: i32) -> (i32, i32) {
    %c0_i32 = arith.constant 0 : i32
    %c0_i32_0 = arith.constant 0 : i32
    return %arg0, %c0_i32 : i32, i32
  }
}

</mosaic_0001>

<bundles_post_ra>
// kernel: tpu_custom_call.1
= control target key start
LH: loop header
LB: loop body
LE: loop exit
PB: predicated region body
PF: predicated region fallthrough
CT: control target
= control target key end

     0   :  { %10 = vsyncpa [#allocation3], 0  ;;  %s413_s0 = inlined_call_operand.hbm [shape: bf16[4,32], index: 0, kind: input, shape index: {}]   ;;  %s414_s1 = inlined_call_operand.vmem [shape: bf16[4,96], index: 1, kind: input, shape index: {}]   ;;  %s415_s2 = inlined_call_operand.vmem [shape: f32[4,3], index: 2, kind: input, shape index: {}]   ;;  %s416_s3 = inlined_call_operand.hbm [shape: bf16[64,128], index: 3, kind: input, shape index: {}]   ;;  %s417_s4 = inlined_call_operand.vmem [shape: f32[1,128], index: 4, kind: input, shape index: {}]   ;;  %s418_s5 = inlined_call_operand.hbm [shape: f32[4,128], index: 5, kind: output, shape index: {}]  }
   0x1   :  { %11 = vsyncpa [#allocation6], 0 }
   0x2   :  { %12 = vsyncpa [#allocation4], 0  ;;  %s319_s18 = smov [#allocation2]   ;;  %s320_s20 = smov [#allocation5]  }
   0x3   :  { %s19_s19 = sshll.u32 %s319_s18, 4  ;;  %s32_s21 = sshll.u32 %s320_s20, 4  ;;  %s20_s19 = int_to_ptr.vmem [resolvable:$true] %s19_s19  ;;  %s361_s21 = int_to_ptr.vmem [resolvable:$true] %s32_s21 }
   0x4   :  { %s247_s24 = scalar_lea.hbm %s413_s0, 32 }
   0x5   :  { %p248_p0 = scmp.ne.s32.totalorder %s413_s0, %s247_s24  ;;  %p251_p1 = scmp.lt.u32.totalorder %s247_s24, %s413_s0 }
   0x7   :  { %p253_p2 = pnand %p251_p1, %p248_p0 }
   0x9   :  { %256 = shalt.err (!%p253_p2)
}
   0xa   :  { %s257_s29 = scalar_lea.vmem %s20_s19, 32  ;;  %p262_p4 = scmp.lt.s32.totalorder %s20_s19, %s20_s19 }
   0xb   :  { %p258_p3 = scmp.ne.s32.totalorder %s20_s19, %s257_s29  ;;  %p263_p5 = scmp.lt.s32.totalorder %s257_s29, %s257_s29 }
   0xd   :  { %p264_p6 = por %p263_p5, %p262_p4 }
   0xf   :  { %p265_p7 = pnand %p264_p6, %p258_p3 }
  0x11   :  { %268 = shalt.err (!%p265_p7)
}
  0x12   :  { %22 = dma.hbm_to_vmem [thread:$0]  %s413_s0, 32, %s20_s19, [#allocation3]  }
  0x13   :  { %s269_s9 = scalar_lea.hbm %s416_s3, 512 }
  0x14   :  { %p270_p8 = scmp.ne.s32.totalorder %s416_s3, %s269_s9  ;;  %p273_p9 = scmp.lt.u32.totalorder %s269_s9, %s416_s3 }
  0x16   :  { %p275_p10 = pnand %p273_p9, %p270_p8 }
  0x18   :  { %278 = shalt.err (!%p275_p10)
}
  0x19   :  { %s279_s14 = scalar_lea.vmem %s361_s21, 512  ;;  %p284_p12 = scmp.lt.s32.totalorder %s361_s21, %s361_s21 }
  0x1a   :  { %p280_p11 = scmp.ne.s32.totalorder %s361_s21, %s279_s14  ;;  %p285_p13 = scmp.lt.s32.totalorder %s279_s14, %s279_s14 }
  0x1c   :  { %p286_p0 = por %p285_p13, %p284_p12 }
  0x1e   :  { %p287_p1 = pnand %p286_p0, %p280_p11 }
  0x20   :  { %290 = shalt.err (!%p287_p1)
}
  0x21   :  { %s321_s0 = smov 64   ;;  %s322_s15 = smov 4  }
  0x22   :  { %38 = dma.hbm_to_vmem [thread:$0]  %s416_s3, 512, %s361_s21, [#allocation6], %s321_s0, %s321_s0, %s322_s15  }
  0x23   :  { %313 = dma.done.wait [#allocation3], 32  }
  0x24   :  { %314 = vsyncadd [#allocation3], 4294967264 }
  0x25   :  { %315 = dma.done.wait [#allocation6], 512  }
  0x26   :  { %316 = vsyncadd [#allocation6], 4294966784  ;;  %v323_v0 = vmov 1   ;;  %v324_v1 = vmov 0   ;;  %v48_v2 = vld [vmem:[%s415_s2] sm:$0xf] }
  0x27   :  { %236 = vset.pattern.permute.xlu0 %v323_v0  ;;  %238 = vset.pattern.permute.xlu1 %v324_v1  ;;  %v325_v3 = vmov 2   ;;  %v49_v4 = vld [vmem:[%s414_s1] sm:$0x3]  ;;  %s326_s3 = smov 96   ;;  %v77_v10 = vld [vmem:[#allocation2] sm:$0x3] }
  0x28   :  { %58 = vperm.xlu0 %236, %v48_v2   ;;  %53 = vperm.xlu1 %238, %v48_v2   ;;  %v50_v5 = vunpack.c.l.bf16 %v49_v4  ;;  %v78_v11 = vunpack.c.l.bf16 %v77_v10  ;;  %vm80_vm0 = vcmask 257024   ;;  %v239_v22 = vld [vmem:[#allocation5] sm:$0xff]   ;;  %v327_v23 = vmov 0.0   ;;  %v240_v24 = vld [vmem:[#allocation5 + $0x8] sm:$0xff]   ;;  %v241_v25 = vld [vmem:[#allocation5 + $0x10] sm:$0xff]   ;;  %s329_s1 = smov 32  }
  0x29   :  { %212 = vmatprep.subr.bf16.mxu0 %v327_v23  ;;  %v242_v28 = vld [vmem:[#allocation5 + $0x18] sm:$0xff]   ;;  %vm328_vm1 = vmmov 0   ;;  %vm98_vm2 = vcmask 261120   ;;  %vm140_vm3 = vcmask 523264   ;;  %v201_v38 = vld [vmem:[%s417_s4] ss:$0 sm:$0xff] }
  0x2a   :  { %v79_v12 = vmul.f32 %v78_v11, %v78_v11  ;;  %213 = vmatpush3.bf16.msra.mxu0 %v239_v22  ;;  %220 = vmatprep.mubr.msk.bf16.mxu0 %vm328_vm1, %v327_v23  ;;  %s330_s23 = smov [#allocation7]  }
  0x2b   :  { %214 = vmatprep.subr.bf16.mxu0 %v327_v23  ;;  %s191_s24 = sshll.u32 %s330_s23, 4  ;;  %s192_s24 = int_to_ptr.vmem [resolvable:$true] %s191_s24 }
  0x2c   :  { %237 = vset.pattern.permute.xlu0 %v325_v3  ;;  %v81_v13 = vsel %vm80_vm0, %v79_v12, 0.0  ;;  %s291_s25 = scalar_lea.vmem %s192_s24, 64  ;;  %p296_p3 = scmp.lt.s32.totalorder %s192_s24, %s192_s24 }
  0x2d   :  { %68 = vperm.xlu0 %237, %v48_v2   ;;  %p292_p2 = scmp.ne.s32.totalorder %s192_s24, %s291_s25  ;;  %p297_p4 = scmp.lt.s32.totalorder %s291_s25, %s291_s25 }
  0x2e   :  { %215 = vmatpush3.bf16.msra.mxu0 %v240_v24 }
  0x2f   :  { %216 = vmatprep.subr.bf16.mxu0 %v327_v23  ;;  %p298_p5 = por %p297_p4, %p296_p3 }
  0x31   :  { %p299_p6 = pnand %p298_p5, %p292_p2 }
  0x32   :  { %217 = vmatpush3.bf16.msra.mxu0 %v241_v25 }
  0x33   :  { %218 = vmatprep.subr.bf16.mxu0 %v327_v23 }
  0x36   :  { %219 = vmatpush3.bf16.msra.mxu0 %v242_v28 }
  0xa7   :  { %v59_v6 = vpop.permute.xlu0 %58  ;;  %v54_v14 = vpop.permute.xlu1 %53 }
  0xa8   :  { %v61_v7 = vmul.f32 %v59_v6, %v50_v5  ;;  %v56_v15 = vmul.f32 %v54_v14, %v50_v5 }
  0xaa   :  { %63 = vrot.lane.b32.xlu1 %v61_v7, %s326_s3 }
  0xac   :  { %v69_v8 = vpop.permute.xlu0 %68 }
  0xad   :  { %v71_v9 = vmul.f32 %v69_v8, %v50_v5 }
  0xaf   :  { %73 = vrot.lane.b32.xlu1 %v71_v9, %s321_s0 }
  0xd3   :  { %82 = vadd.xlane.f32.xlu1 %v81_v13 }
 0x11c   :  { %v64_v16 = vpop.permute.xlu1 %63 }
 0x11d   :  { %v66_v17 = vadd.f32 %v64_v16, %v56_v15 }
 0x121   :  { %v74_v18 = vpop.permute.xlu1 %73 }
 0x122   :  { %v76_v19 = vadd.f32 %v74_v18, %v66_v17 }
 0x124   :  { %v87_v20 = vmul.f32 %v76_v19, %v76_v19 }
 0x126   :  { %v88_v21 = vsel %vm80_vm0, %v87_v20, 0.0 }
 0x127   :  { %89 = vadd.xlane.f32.xlu0 %v88_v21 }
 0x160   :  { %v83_v31 = vpop.xlane.xlu1 %82 }
 0x161   :  { %v84_v32 = vmax.f32 %v83_v31, 1e-24 }
 0x1b4   :  { %v90_v26 = vpop.xlane.xlu0 %89 }
 0x1b5   :  { %v91_v27 = vmax.f32 %v90_v26, 1e-24 }
 0x1b7   :  { %243 = vrsqrt.f32 %v91_v27 }
 0x1b8   :  { %245 = vrsqrt.f32 %v84_v32 }
 0x1c1   :  { %v244_v29 = vpop.eup %243 }
 0x1c2   :  { %v93_v30 = vmul.f32 %v244_v29, %v76_v19  ;;  %v246_v33 = vpop.eup %245 }
 0x1c3   :  { %v86_v34 = vmul.f32 %v246_v33, %v78_v11 }
 0x1c4   :  { %95 = vrot.lane.b32.xlu0 %v93_v30, %s329_s1 }
 0x236   :  { %v96_v35 = vpop.permute.xlu0 %95 }
 0x237   :  { %v99_v36 = vsel %vm98_vm2, %v86_v34, %v96_v35 }
 0x238   :  { %v100_v37 = vpack.c.bf16 %v99_v36, %v99_v36 }
 0x23a   :  { %221 = vmatmul.mubr.msk.bf16.vlgmr.msra.gmra.mrb[0].mxu0 %vm140_vm3, %v100_v37 }
 0x30d   :  { %v178_v39 = vpop.f32.mrb[0].mxu0 }
 0x30e   :  { %v179_v40 = vadd.f32 %v201_v38, %v178_v39  ;;  %v222_v41 = vpop.f32.mrb[1].mxu0 }
 0x30f   :  { %v181_v42 = vpop.f32.mrb[2].mxu0 }
 0x310   :  { %184 = vst [vmem:[#allocation7] sm:$0xf] %v179_v40  ;;  %v223_v43 = vpop.f32.mrb[3].mxu0 }
 0x311   :  { %302 = shalt.err (!%p299_p6)
}
 0x312   :  { %s303_s4 = scalar_lea.hbm %s418_s5, 64 }
 0x313   :  { %p304_p7 = scmp.ne.s32.totalorder %s418_s5, %s303_s4  ;;  %p307_p8 = scmp.lt.u32.totalorder %s303_s4, %s418_s5 }
 0x315   :  { %p309_p9 = pnand %p307_p8, %p304_p7 }
 0x317   :  { %312 = shalt.err (!%p309_p9)
}
 0x318   :  { %194 = dma.vmem_to_hbm [thread:$0]  %s192_s24, 64, %s418_s5, [#allocation4]  }
 0x319   :  { %317 = dma.done.wait [#allocation4], 64  }
 0x31a   :  { %318 = vsyncadd [#allocation4], 4294967232 }
 0x31b   :  { %198 = vsyncpa [#allocation3], 1 }
 0x31c   :  { %199 = vsyncpa [#allocation6], 1 }
 0x31d   :  { %200 = vsyncpa [#allocation4], 1 }

</bundles_post_ra>
